<compile_context>
chip_gen: v7x
topology: tpu7x:2x2x1
jax: 0.10.0
libtpu: 0.0.40
codegen_flags: <defaults>
</compile_context>

<pallas_src>
import functools
import math

import jax
import jax.numpy as jnp
from jax.experimental import pallas as pl
from jax.experimental.pallas import tpu as pltpu


def _cdiv(a, b):
    return -(-a // b)


# ----------------------------------------------------------------------------
# One-time probe: pltpu.roll is expected to follow np.roll (out[:, n] = in[:, n-1]
# for shift=1).  Probe once so the conv taps stay correct under either convention.
# ----------------------------------------------------------------------------
def _roll_probe_kernel(x_ref, o_ref):
    o_ref[...] = pltpu.roll(x_ref[...], 1, 1)


@functools.lru_cache(maxsize=None)
def _roll_matches_numpy():
    x = jnp.broadcast_to(jnp.arange(128, dtype=jnp.float32), (8, 128))
    out = pl.pallas_call(
        _roll_probe_kernel,
        out_shape=jax.ShapeDtypeStruct((8, 128), jnp.float32),
    )(x)
    # numpy convention: out[:, 1] == in[:, 0] == 0
    return bool(out[0, 1] == 0.0)


# ----------------------------------------------------------------------------
# Kernel: one grid step handles a lane-dense (F, N) slab, N = bblk*T columns
# ordered batch-major / time-minor.  Everything stays channel-major (C, N).
# ----------------------------------------------------------------------------
def tcn_attention_kernel(roll_fwd, x_ref, w1_ref, b1_ref, w2_ref, b2_ref,
                         ww_ref, bw_ref, vv_ref, bv_ref, wh_ref, bh_ref,
                         heads_ref, attn_ref):
    _, N = x_ref.shape
    _, BBLK, T = attn_ref.shape
    C = b1_ref.shape[0]

    # Time index of every column, built from a (BBLK, T) iota (no integer rem).
    t_idx = jax.lax.broadcasted_iota(jnp.int32, (BBLK, T), 1).reshape(1, N)
    is_t0 = t_idx == 0
    is_tl = t_idx == T - 1

    # Static lane-roll amounts giving "previous column" / "next column".
    sh_prev = 1 if roll_fwd else N - 1
    sh_next = N - 1 if roll_fwd else 1

    def conv3_relu(a, w_ref, b_ref):
        """Conv1d(kernel=3, padding=1) along time + ReLU on (D, N) activations.
        Three shifted matmuls summed into one accumulator; shifts are XLU lane
        rolls, boundary masks zero the wrapped column at t==0 / t==T-1 (this is
        exactly the conv's zero padding, and prevents cross-batch-row bleed)."""
        prev = jnp.where(is_t0, 0.0, pltpu.roll(a, sh_prev, 1))   # col n <- a[:, n-1]
        nxt = jnp.where(is_tl, 0.0, pltpu.roll(a, sh_next, 1))    # col n <- a[:, n+1]
        h = (jnp.dot(w_ref[0], prev, preferred_element_type=jnp.float32)
             + jnp.dot(w_ref[1], a, preferred_element_type=jnp.float32)
             + jnp.dot(w_ref[2], nxt, preferred_element_type=jnp.float32)
             + b_ref[...])
        return jnp.maximum(h, 0.0)

    h1 = conv3_relu(x_ref[...], w1_ref, b1_ref)        # (C, N)
    h2 = conv3_relu(h1, w2_ref, b2_ref)                # (C, N)

    # Attention scores: V(tanh(W h + bw)) + bv, channel-major throughout.
    s = jnp.tanh(jnp.dot(ww_ref[...], h2, preferred_element_type=jnp.float32)
                 + bw_ref[...])                         # (C, N)
    score = jnp.dot(vv_ref[...], s,
                    preferred_element_type=jnp.float32) + bv_ref[...]   # (1, N)

    # Softmax over time within each batch row (only the tiny score is reshaped).
    score2 = score.reshape(BBLK, T)
    m = jnp.max(score2, axis=-1, keepdims=True)
    e = jnp.exp(score2 - m)
    attn = e * pl.reciprocal(jnp.sum(e, axis=-1, keepdims=True))  # exact divide; (BBLK,1) is tiny
    attn_ref[...] = attn[None]

    # Context vector, mean over time, kept channel-major: (C, BBLK).
    # This is the single large relayout left in the kernel.
    h2_t = h2.reshape(C, BBLK, T)
    ctx = jnp.sum(h2_t * attn[None], axis=-1) * (1.0 / T)         # (C, BBLK)

    # Fused heads (8, BBLK): rows 0-2 price mean, rows 3-5 softplus uncertainty,
    # rows 6-7 padding.  Batch stays on the lane axis -> unmasked lane-dense store.
    head = jnp.dot(wh_ref[...], ctx,
                   preferred_element_type=jnp.float32) + bh_ref[...]     # (8, BBLK)
    sp = jnp.maximum(head, 0.0) + jnp.log(1.0 + jnp.exp(-jnp.abs(head)))  # stable softplus
    row = jax.lax.broadcasted_iota(jnp.int32, head.shape, 0)
    heads_ref[...] = jnp.where(row < 3, head, sp)[None]


# ----------------------------------------------------------------------------
# Blocking choice (batch rows per grid step).
# ----------------------------------------------------------------------------
def _choose_blocking(B, T, C):
    """Pick (bblk, nb).  Goals:
      * bblk*T (columns/block) is a multiple of 128 whenever nb > 1
        (lane-aligned blocks; a single block covers the full array instead);
      * cap columns/block by VMEM (~8 live f32 (C, cols) intermediates/step);
      * use >= 2 blocks once B >= 16 so the batch axis splits across v7x's
        two TensorCores (harmless on single-core v5e/v6e);
      * prefer bblk that divides B (avoids padded batch rows)."""
    max_cols = max(128, ((8 << 20) // (32 * C)) // 128 * 128)
    step = 128 // math.gcd(T, 128)          # smallest bblk with bblk*T % 128 == 0
    if B * T <= max_cols:
        if B >= 16 and B >= 2 * step:
            bblk = step * _cdiv(_cdiv(B, 2), step)   # ~half the batch, lane-aligned
        else:
            return B, 1
    else:
        bblk = max(step, (max_cols // T) // step * step)
    nb = _cdiv(B, bblk)
    return (B, 1) if nb <= 1 else (bblk, nb)


# ----------------------------------------------------------------------------
# Wrapper
# ----------------------------------------------------------------------------
def tcn_with_attention(x, p, bblk=None):
    """x: (B, T, F) float32; p: params in PyTorch layouts (see init_params).
    Returns (mean (B,3), std (B,3), attention_weights (B,T,1))."""
    B, T, F = x.shape
    C = p['b1'].shape[0]
    x = x.astype(jnp.float32)

    if bblk is None:
        bblk, nb = _choose_blocking(B, T, C)
    else:
        bblk = min(max(int(bblk), 1), B)
        nb = _cdiv(B, bblk)
        if nb > 1 and (bblk * T) % 128 != 0:   # keep blocks lane-aligned
            step = 128 // math.gcd(T, 128)
            bblk = step * _cdiv(bblk, step)
            nb = _cdiv(B, bblk)
        if nb == 1:
            bblk = B
    Bp = nb * bblk

    if Bp != B:                                # only when bblk doesn't divide B
        x = jnp.pad(x, ((0, Bp - B), (0, 0), (0, 0)))
    # One-time layout plumbing: channel-major lane-dense (F, Bp*T) slab, columns
    # ordered batch-major / time-minor (matches the kernel's per-block layout).
    xt = jnp.transpose(x, (2, 0, 1)).reshape(F, Bp * T)

    f32 = jnp.float32
    w1k = jnp.transpose(p['w1'], (2, 0, 1)).astype(f32)       # (3, C, F); tap k -> x[t+k-1]
    b1k = p['b1'].reshape(C, 1).astype(f32)
    w2k = jnp.transpose(p['w2'], (2, 0, 1)).astype(f32)       # (3, C, C)
    b2k = p['b2'].reshape(C, 1).astype(f32)
    wwk = p['ww'].astype(f32)                                 # (C, C): s_col = ww @ h_col + bw
    bwk = p['bw'].reshape(C, 1).astype(f32)
    vvk = p['vv'].astype(f32)                                 # (1, C)
    bvk = p['bv'].reshape(1, 1).astype(f32)
    whk = jnp.concatenate([p['wp'], p['wu'],
                           jnp.zeros((2, C), f32)], axis=0).astype(f32)   # (8, C)
    bhk = jnp.concatenate([p['bp'], p['bu'],
                           jnp.zeros((2,), f32)]).reshape(8, 1).astype(f32)

    def rep(a):                                # grid-invariant (weight) inputs
        zeros = (0,) * a.ndim
        return pl.BlockSpec(a.shape, lambda i, _z=zeros: _z)

    in_specs = [
        pl.BlockSpec((F, bblk * T), lambda i: (0, i)),        # activation slab
        rep(w1k), rep(b1k), rep(w2k), rep(b2k),
        rep(wwk), rep(bwk), rep(vvk), rep(bvk),
        rep(whk), rep(bhk),
    ]
    out_specs = [
        pl.BlockSpec((1, 8, bblk), lambda i: (i, 0, 0)),      # fused heads, batch on lanes
        pl.BlockSpec((1, bblk, T), lambda i: (i, 0, 0)),      # attention weights
    ]
    out_shape = (
        jax.ShapeDtypeStruct((nb, 8, bblk), f32),
        jax.ShapeDtypeStruct((nb, bblk, T), f32),
    )

    kernel = functools.partial(tcn_attention_kernel, _roll_matches_numpy())
    heads, attn = pl.pallas_call(
        kernel,
        out_shape=out_shape,
        grid_spec=pltpu.PrefetchScalarGridSpec(
            num_scalar_prefetch=0,
            grid=(nb,),
            in_specs=in_specs,
            out_specs=out_specs,
        ),
        compiler_params=pltpu.CompilerParams(
            dimension_semantics=("parallel",),       # batch blocks across TCs (v7x)
            vmem_limit_bytes=40 * 1024 * 1024,       # > v5e 16MiB default, < v7x 64MiB cap
        ),
    )(xt, w1k, b1k, w2k, b2k, wwk, bwk, vvk, bvk, whk, bhk)

    heads = jnp.transpose(heads, (0, 2, 1)).reshape(Bp, 8)    # tiny, wrapper-side
    mean = heads[:B, 0:3]
    std = heads[:B, 3:6]
    attn = attn.reshape(Bp, T)[:B, :, None]                   # module semantics: (B, T, 1)
    return mean, std, attn


# ----------------------------------------------------------------------------
# Parameters (PyTorch layouts) and pure-JAX reference for self-checking.
# ----------------------------------------------------------------------------
def init_params(key, F, C):
    """Parameters in PyTorch layouts (Conv1d: (out,in,k); Linear: (out,in))."""
    ks = jax.random.split(key, 12)

    def lin(kw, kb, fan_in, wshape, bshape):
        bound = 1.0 / (fan_in ** 0.5)
        w = jax.random.uniform(kw, wshape, jnp.float32, -bound, bound)
        b = jax.random.uniform(kb, bshape, jnp.float32, -bound, bound)
        return w, b

    w1, b1 = lin(ks[0], ks[1], F * 3, (C, F, 3), (C,))
    w2, b2 = lin(ks[2], ks[3], C * 3, (C, C, 3), (C,))
    ww, bw = lin(ks[4], ks[5], C, (C, C), (C,))
    vv, bv = lin(ks[6], ks[7], C, (1, C), (1,))
    wp, bp = lin(ks[8], ks[9], C, (3, C), (3,))
    wu, bu = lin(ks[10], ks[11], C, (3, C), (3,))
    return dict(w1=w1, b1=b1, w2=w2, b2=b2, ww=ww, bw=bw,
                vv=vv, bv=bv, wp=wp, bp=bp, wu=wu, bu=bu)


def reference(x, p):
    """Pure-JAX reference mirroring the PyTorch forward (torch weight layouts)."""
    h = jax.lax.conv_general_dilated(
        jnp.transpose(x, (0, 2, 1)), p['w1'], (1,), [(1, 1)],
        dimension_numbers=('NCH', 'OIH', 'NCH'))
    h = jax.nn.relu(h + p['b1'][None, :, None])
    h = jax.lax.conv_general_dilated(
        h, p['w2'], (1,), [(1, 1)],
        dimension_numbers=('NCH', 'OIH', 'NCH'))
    h = jax.nn.relu(h + p['b2'][None, :, None])
    h = jnp.transpose(h, (0, 2, 1))                       # (B, T, C)
    s = jnp.tanh(h @ p['ww'].T + p['bw'])
    score = s @ p['vv'].T + p['bv']                       # (B, T, 1)
    attn = jax.nn.softmax(score, axis=1)
    ctx = attn * h
    cm = ctx.mean(axis=1)
    mean = cm @ p['wp'].T + p['bp']
    std = jax.nn.softplus(cm @ p['wu'].T + p['bu'])
    return mean, std, attn


if __name__ == "__main__":
    key = jax.random.PRNGKey(0)
    kx, kp = jax.random.split(key)
    B, T, F, C = 8, 16, 8, 32   # batch, seq len, num_features, num_channels
    x = jax.random.normal(kx, (B, T, F), jnp.float32)
    params = init_params(kp, F, C)

    mean, std, attn = tcn_with_attention(x, params)
    jax.block_until_ready((mean, std, attn))

    rm, rs, ra = reference(x, params)
    assert mean.shape == (B, 3) and std.shape == (B, 3) and attn.shape == (B, T, 1)
    assert jnp.allclose(mean, rm, atol=1e-4, rtol=1e-4)
    assert jnp.allclose(std, rs, atol=1e-4, rtol=1e-4)
    assert jnp.allclose(attn, ra, atol=1e-4, rtol=1e-4)

    # Also exercise the multi-block (nb >= 2, megacore-parallel) path once.
    B2 = 16
    x2 = jax.random.normal(jax.random.PRNGKey(1), (B2, T, F), jnp.float32)
    m2, s2, a2 = tcn_with_attention(x2, params)
    jax.block_until_ready((m2, s2, a2))
    rm2, rs2, ra2 = reference(x2, params)
    assert jnp.allclose(m2, rm2, atol=1e-4, rtol=1e-4)
    assert jnp.allclose(s2, rs2, atol=1e-4, rtol=1e-4)
    assert jnp.allclose(a2, ra2, atol=1e-4, rtol=1e-4)

    print("KERNEL_OK")
</pallas_src>

<mosaic_0001>
module attributes {stable_mosaic.version = 11 : i64} {
  func.func @_roll_probe_kernel(%arg0: memref<8x128xf32, #tpu.memory_space<vmem>>, %arg1: memref<8x128xf32, #tpu.memory_space<vmem>>) attributes {dimension_semantics = [], scalar_prefetch = 0 : i64, scratch_operands = 0 : i64, tpu.core_type = #tpu.core_type<tc>} {
    %c0 = arith.constant 0 : index
    %c0_0 = arith.constant 0 : index
    %0 = vector.load %arg0[%c0, %c0_0] : memref<8x128xf32, #tpu.memory_space<vmem>>, vector<8x128xf32>
    %c1_i32 = arith.constant 1 : i32
    %1 = tpu.dynamic_rotate %0 by %c1_i32 dim 1 : vector<8x128xf32>, i32 -> vector<8x128xf32>
    %c0_1 = arith.constant 0 : index
    %c0_2 = arith.constant 0 : index
    %2 = vector.load %arg1[%c0_1, %c0_2] : memref<8x128xf32, #tpu.memory_space<vmem>>, vector<8x128xf32>
    tpu.vector_store %arg1[%c0_1, %c0_2], %1 {strides = array<i32>} : memref<8x128xf32, #tpu.memory_space<vmem>>, vector<8x128xf32>,
    return
  }
}

</mosaic_0001>

<bundles_post_ra>
// kernel: tpu_custom_call.1
= control target key start
LH: loop header
LB: loop body
LE: loop exit
PB: predicated region body
PF: predicated region fallthrough
CT: control target
= control target key end

     0   :  { %6 = vsyncpa [#allocation3], 0  ;;  %s128_s0 = inlined_call_operand.hbm [shape: f32[8,128], index: 0, kind: input, shape index: {}]   ;;  %s129_s1 = inlined_call_operand.hbm [shape: f32[8,128], index: 1, kind: output, shape index: {}]  }
   0x1   :  { %7 = vsyncpa [#allocation4], 0  ;;  %s91_s6 = smov [#allocation2]   ;;  %s43_s10 = scalar_lea.hbm %s128_s0, 128 }
   0x2   :  { %s14_s7 = sshll.u32 %s91_s6, 4  ;;  %p44_p0 = scmp.ne.s32.totalorder %s128_s0, %s43_s10  ;;  %s15_s7 = int_to_ptr.vmem [resolvable:$true] %s14_s7 }
   0x3   :  { %p47_p1 = scmp.lt.u32.totalorder %s43_s10, %s128_s0 }
   0x5   :  { %p49_p2 = pnand %p47_p1, %p44_p0 }
   0x7   :  { %52 = shalt.err (!%p49_p2)
}
   0x8   :  { %s53_s15 = scalar_lea.vmem %s15_s7, 128  ;;  %p58_p4 = scmp.lt.s32.totalorder %s15_s7, %s15_s7 }
   0x9   :  { %p54_p3 = scmp.ne.s32.totalorder %s15_s7, %s53_s15  ;;  %p59_p5 = scmp.lt.s32.totalorder %s53_s15, %s53_s15 }
   0xb   :  { %p60_p6 = por %p59_p5, %p58_p4 }
   0xd   :  { %p61_p7 = pnand %p60_p6, %p54_p3 }
   0xf   :  { %64 = shalt.err (!%p61_p7)
}
  0x10   :  { %17 = dma.hbm_to_vmem [thread:$0]  %s128_s0, 128, %s15_s7, [#allocation3]  }
  0x11   :  { %87 = dma.done.wait [#allocation3], 128  }
  0x12   :  { %88 = vsyncadd [#allocation3], 4294967168  ;;  %v21_v0 = vld [vmem:[#allocation2] sm:$0xff]  ;;  %s92_s18 = smov 1   ;;  %s93_s19 = smov [#allocation5]  }
  0x13   :  { %22 = vrot.lane.b32.xlu0 %v21_v0, %s92_s18  ;;  %s31_s20 = sshll.u32 %s93_s19, 4  ;;  %s32_s20 = int_to_ptr.vmem [resolvable:$true] %s31_s20 }
  0x14   :  { %s65_s21 = scalar_lea.vmem %s32_s20, 128  ;;  %p70_p9 = scmp.lt.s32.totalorder %s32_s20, %s32_s20 }
  0x15   :  { %p66_p8 = scmp.ne.s32.totalorder %s32_s20, %s65_s21  ;;  %p71_p10 = scmp.lt.s32.totalorder %s65_s21, %s65_s21 }
  0x17   :  { %p72_p11 = por %p71_p10, %p70_p9 }
  0x19   :  { %p73_p12 = pnand %p72_p11, %p66_p8 }
  0x85   :  { %v23_v1 = vpop.permute.xlu0 %22 }
  0x86   :  { %24 = vst [vmem:[#allocation5] sm:$0xff] %v23_v1 }
  0x87   :  { %76 = shalt.err (!%p73_p12)
}
  0x88   :  { %s77_s0 = scalar_lea.hbm %s129_s1, 128 }
  0x89   :  { %p78_p13 = scmp.ne.s32.totalorder %s129_s1, %s77_s0  ;;  %p81_p0 = scmp.lt.u32.totalorder %s77_s0, %s129_s1 }
  0x8b   :  { %p83_p1 = pnand %p81_p0, %p78_p13 }
  0x8d   :  { %86 = shalt.err (!%p83_p1)
}
  0x8e   :  { %34 = dma.vmem_to_hbm [thread:$0]  %s32_s20, 128, %s129_s1, [#allocation4]  }
  0x8f   :  { %89 = dma.done.wait [#allocation4], 128  }
  0x90   :  { %90 = vsyncadd [#allocation4], 4294967168 }
  0x91   :  { %38 = vsyncpa [#allocation3], 1 }
  0x92   :  { %39 = vsyncpa [#allocation4], 1 }

</bundles_post_ra>
